<compile_context>
chip_gen: v6e
topology: v6e:2x2x1
jax: 0.10.0
libtpu: 0.0.40
codegen_flags: <defaults>
</compile_context>

<pallas_src>
import jax
import jax.numpy as jnp
from jax.experimental import pallas as pl
from jax.experimental.pallas import tpu as pltpu


TILE_B_CAP = 4096  # max batch rows per grid step (multiple of 128)


def _round_up(n, m):
    return ((n + m - 1) // m) * m


def _use_bf16_activations():
    """bf16 bias-add + tanh only on chips with bf16 VPU/EUP (v6e / v7x)."""
    try:
        kind = jax.devices()[0].device_kind.lower()
    except Exception:
        return False
    return ("v6" in kind) or ("v7" in kind)


def _pick_tile_b(B, cap=TILE_B_CAP):
    """Lane-dense (multiple-of-128) batch tile.

    Small B: pad only to the 128-lane minimum (avoid computing on mostly
    zero-padded lanes).  Larger B: keep grid >= 2 so v7x's two TensorCores
    both get work, capped so f32 intermediates stay a few MB in VMEM.
    """
    b = _round_up(max(int(B), 1), 128)
    if b <= 128:
        return 128
    return min(cap, _round_up(pl.cdiv(b, 2), 128))


def _make_mlp_kernel(act_dtype):
    def kernel(x_ref,
               w1_ref, b1_ref,
               w2_ref, b2_ref,
               w3_ref, b3_ref,
               w4_ref, b4_ref,
               o_ref):
        # x_ref: (8, TB) bf16; w1..w3: bf16 (out, in) with sigmoid affine folded
        # b1..b3: (out, 1) act_dtype; w4_ref: (128, 1) f32; b4_ref: (1, 1) f32
        x = x_ref[...]                                             # (8, TB) bf16

        # Layer 1: u1 = 0.5*(W1 x + b1); activation is a bare tanh (the
        # sigmoid's 0.5*t + 0.5 affine is folded into the next layer's W/b).
        acc = jnp.dot(w1_ref[...], x, preferred_element_type=jnp.float32)
        t = jnp.tanh(acc.astype(act_dtype) + b1_ref[...])          # (32, TB)

        # Layer 2
        acc = jnp.dot(w2_ref[...], t.astype(jnp.bfloat16),
                      preferred_element_type=jnp.float32)
        t = jnp.tanh(acc.astype(act_dtype) + b2_ref[...])          # (64, TB)

        # Layer 3
        acc = jnp.dot(w3_ref[...], t.astype(jnp.bfloat16),
                      preferred_element_type=jnp.float32)
        t = jnp.tanh(acc.astype(act_dtype) + b3_ref[...])          # (128, TB)

        # Layer 4 (128 -> 1): VPU multiply (f32 via promotion) + sublane reduce.
        out = jnp.sum(t * w4_ref[...], axis=0, keepdims=True) + b4_ref[...]
        o_ref[...] = out.astype(o_ref.dtype)                       # (1, TB)

    return kernel


def regression_forward(x, params, *, tile_b=None):
    """Forward pass of the PyTorch `Regression` MLP (eval mode).

    x: (B, 8) float.  Returns (B, 1) float32.
    """
    (w1, b1), (w2, b2), (w3, b3), (w4, b4) = params
    B = x.shape[0]
    if tile_b is None:
        tile_b = _pick_tile_b(B)
    G = pl.cdiv(B, tile_b)
    Bp = G * tile_b

    use_bf16_act = _use_bf16_activations()
    act_dtype = jnp.bfloat16 if use_bf16_act else jnp.float32

    # Lane-dense transposed input (features on sublanes, batch on lanes),
    # cast to bf16 in the wrapper so the pad/transpose HBM pass and the
    # per-step input DMA are halved.
    xt = jnp.pad(x.astype(jnp.bfloat16), ((0, Bp - B), (0, 0))).T   # (8, Bp)

    # Fold the sigmoid affine parts into the weights (exact identity):
    #   sigmoid(z) = 0.5*tanh(0.5*z) + 0.5
    # (the 0.5 / 0.25 scales are powers of two, so the bf16 weight cast is
    #  bit-equivalent to casting first and scaling after).
    w1f = (0.5 * w1).astype(jnp.bfloat16)                           # (32, 8)
    b1f = (0.5 * b1).astype(act_dtype)                              # (32, 1)
    w2f = (0.25 * w2).astype(jnp.bfloat16)                          # (64, 32)
    b2f = (0.5 * b2 + 0.25 * jnp.sum(w2, axis=1, keepdims=True)).astype(act_dtype)
    w3f = (0.25 * w3).astype(jnp.bfloat16)                          # (128, 64)
    b3f = (0.5 * b3 + 0.25 * jnp.sum(w3, axis=1, keepdims=True)).astype(act_dtype)
    w4f = (0.5 * w4).T.astype(jnp.float32)                          # (128, 1)
    b4f = (b4 + 0.5 * jnp.sum(w4, axis=1, keepdims=True)).astype(jnp.float32)

    def const_spec(a):
        # Full-array block with constant index_map -> stays VMEM-resident.
        return pl.BlockSpec(a.shape, lambda i: (0, 0))

    out = pl.pallas_call(
        _make_mlp_kernel(act_dtype),
        out_shape=jax.ShapeDtypeStruct((1, Bp), jnp.float32),
        grid=(G,),
        in_specs=[
            pl.BlockSpec((8, tile_b), lambda i: (0, i)),            # x block
            const_spec(w1f), const_spec(b1f),
            const_spec(w2f), const_spec(b2f),
            const_spec(w3f), const_spec(b3f),
            const_spec(w4f), const_spec(b4f),
        ],
        out_specs=pl.BlockSpec((1, tile_b), lambda i: (0, i)),      # lane-dense
        compiler_params=pltpu.CompilerParams(
            dimension_semantics=("parallel",)),
    )(xt, w1f, b1f, w2f, b2f, w3f, b3f, w4f, b4f)

    return out[0, :B].reshape(B, 1)


def init_params(key):
    """PyTorch Linear init: U(-1/sqrt(fan_in), +1/sqrt(fan_in)); W is (out, in)."""
    dims = [(8, 32), (32, 64), (64, 128), (128, 1)]
    params = []
    for fan_in, fan_out in dims:
        key, kw, kb = jax.random.split(key, 3)
        bound = 1.0 / jnp.sqrt(jnp.float32(fan_in))
        w = jax.random.uniform(kw, (fan_out, fan_in), jnp.float32, -bound, bound)
        b = jax.random.uniform(kb, (fan_out, 1), jnp.float32, -bound, bound)
        params.append((w, b))
    return params


def _reference(x, params):
    """Pure-JAX reference: sigmoid MLP with bf16 MXU operands / f32 accum."""
    (w1, b1), (w2, b2), (w3, b3), (w4, b4) = params
    h = x.T.astype(jnp.float32)                                     # (8, B)
    for w, b in ((w1, b1), (w2, b2), (w3, b3)):
        z = jnp.dot(w.astype(jnp.bfloat16), h.astype(jnp.bfloat16),
                    preferred_element_type=jnp.float32) + b
        h = jax.nn.sigmoid(z)
    out = jnp.dot(w4, h) + b4                                       # (1, B)
    return out.T                                                    # (B, 1)


if __name__ == "__main__":
    key = jax.random.PRNGKey(0)
    params = init_params(key)

    # Small-batch check (B=8 -> single 128-lane tile).
    key, kx = jax.random.split(key)
    B = 8
    x = jax.random.normal(kx, (B, 8), dtype=jnp.float32)
    out = jax.block_until_ready(regression_forward(x, params))
    ref = _reference(x, params)
    assert out.shape == (B, 1), out.shape
    assert jnp.allclose(out, ref, atol=1e-2, rtol=1e-2), (out, ref)

    # Multi-tile check (exercises the pipelined "parallel" batch grid, G=2).
    key, kx2 = jax.random.split(key)
    B2 = 300
    x2 = jax.random.normal(kx2, (B2, 8), dtype=jnp.float32)
    out2 = jax.block_until_ready(regression_forward(x2, params))
    ref2 = _reference(x2, params)
    assert out2.shape == (B2, 1), out2.shape
    assert jnp.allclose(out2, ref2, atol=1e-2, rtol=1e-2)

    print("KERNEL_OK")
</pallas_src>

<mosaic_0001>
module attributes {stable_mosaic.version = 11 : i64} {
  func.func @kernel(%arg0: i32, %arg1: memref<8x128xbf16, #tpu.memory_space<vmem>>, %arg2: memref<32x8xbf16, #tpu.memory_space<vmem>>, %arg3: memref<32x1xf32, #tpu.memory_space<vmem>>, %arg4: memref<64x32xbf16, #tpu.memory_space<vmem>>, %arg5: memref<64x1xf32, #tpu.memory_space<vmem>>, %arg6: memref<128x64xbf16, #tpu.memory_space<vmem>>, %arg7: memref<128x1xf32, #tpu.memory_space<vmem>>, %arg8: memref<128x1xf32, #tpu.memory_space<vmem>>, %arg9: memref<1x1xf32, #tpu.memory_space<vmem>>, %arg10: memref<1x128xf32, #tpu.memory_space<vmem>>) attributes {dimension_semantics = [#tpu.dimension_semantics<parallel>], iteration_bounds = array<i64: 1>, scalar_prefetch = 0 : i64, scratch_operands = 0 : i64, tpu.core_type = #tpu.core_type<tc>, window_params = [{transform_indices = @transform_0, window_bounds = array<i64: 8, 128>}, {pipeline_mode = #tpu.pipeline_mode<synchronous>, transform_indices = @transform_1, window_bounds = array<i64: 32, 8>}, {pipeline_mode = #tpu.pipeline_mode<synchronous>, transform_indices = @transform_2, window_bounds = array<i64: 32, 1>}, {pipeline_mode = #tpu.pipeline_mode<synchronous>, transform_indices = @transform_3, window_bounds = array<i64: 64, 32>}, {pipeline_mode = #tpu.pipeline_mode<synchronous>, transform_indices = @transform_4, window_bounds = array<i64: 64, 1>}, {pipeline_mode = #tpu.pipeline_mode<synchronous>, transform_indices = @transform_5, window_bounds = array<i64: 128, 64>}, {pipeline_mode = #tpu.pipeline_mode<synchronous>, transform_indices = @transform_6, window_bounds = array<i64: 128, 1>}, {pipeline_mode = #tpu.pipeline_mode<synchronous>, transform_indices = @transform_7, window_bounds = array<i64: 128, 1>}, {pipeline_mode = #tpu.pipeline_mode<synchronous>, transform_indices = @transform_8, window_bounds = array<i64: 1, 1>}, {transform_indices = @transform_9, window_bounds = array<i64: 1, 128>}]} {
    %c0 = arith.constant 0 : index
    %c0_0 = arith.constant 0 : index
    %0 = vector.load %arg1[%c0, %c0_0] : memref<8x128xbf16, #tpu.memory_space<vmem>>, vector<8x128xbf16>
    %c0_1 = arith.constant 0 : index
    %c0_2 = arith.constant 0 : index
    %1 = vector.load %arg2[%c0_1, %c0_2] : memref<32x8xbf16, #tpu.memory_space<vmem>>, vector<32x8xbf16>
    %cst = arith.constant dense<0.000000e+00> : vector<32x128xf32>
    %2 = tpu.matmul %1, %0, %cst {dimension_numbers = #tpu.dot_dimension_numbers<[1], [0], [0], [1], [0, 0, 1, 1], [], []>} : vector<32x8xbf16>, vector<8x128xbf16>, vector<32x128xf32> -> vector<32x128xf32>
    %c0_3 = arith.constant 0 : index
    %c0_4 = arith.constant 0 : index
    %3 = vector.load %arg3[%c0_3, %c0_4] : memref<32x1xf32, #tpu.memory_space<vmem>>, vector<32x1xf32>
    %4 = vector.broadcast %3 : vector<32x1xf32> to vector<32x128xf32>
    %5 = arith.addf %2, %4 : vector<32x128xf32>
    %6 = math.tanh %5 : vector<32x128xf32>
    %c0_5 = arith.constant 0 : index
    %c0_6 = arith.constant 0 : index
    %7 = vector.load %arg4[%c0_5, %c0_6] : memref<64x32xbf16, #tpu.memory_space<vmem>>, vector<64x32xbf16>
    %8 = arith.truncf %6 : vector<32x128xf32> to vector<32x128xbf16>
    %cst_7 = arith.constant dense<0.000000e+00> : vector<64x128xf32>
    %9 = tpu.matmul %7, %8, %cst_7 {dimension_numbers = #tpu.dot_dimension_numbers<[1], [0], [0], [1], [0, 0, 1, 1], [], []>} : vector<64x32xbf16>, vector<32x128xbf16>, vector<64x128xf32> -> vector<64x128xf32>
    %c0_8 = arith.constant 0 : index
    %c0_9 = arith.constant 0 : index
    %10 = vector.load %arg5[%c0_8, %c0_9] : memref<64x1xf32, #tpu.memory_space<vmem>>, vector<64x1xf32>
    %11 = vector.broadcast %10 : vector<64x1xf32> to vector<64x128xf32>
    %12 = arith.addf %9, %11 : vector<64x128xf32>
    %13 = math.tanh %12 : vector<64x128xf32>
    %c0_10 = arith.constant 0 : index
    %c0_11 = arith.constant 0 : index
    %14 = vector.load %arg6[%c0_10, %c0_11] : memref<128x64xbf16, #tpu.memory_space<vmem>>, vector<128x64xbf16>
    %15 = arith.truncf %13 : vector<64x128xf32> to vector<64x128xbf16>
    %cst_12 = arith.constant dense<0.000000e+00> : vector<128x128xf32>
    %16 = tpu.matmul %14, %15, %cst_12 {dimension_numbers = #tpu.dot_dimension_numbers<[1], [0], [0], [1], [0, 0, 1, 1], [], []>} : vector<128x64xbf16>, vector<64x128xbf16>, vector<128x128xf32> -> vector<128x128xf32>
    %c0_13 = arith.constant 0 : index
    %c0_14 = arith.constant 0 : index
    %17 = vector.load %arg7[%c0_13, %c0_14] : memref<128x1xf32, #tpu.memory_space<vmem>>, vector<128x1xf32>
    %18 = vector.broadcast %17 : vector<128x1xf32> to vector<128x128xf32>
    %19 = arith.addf %16, %18 : vector<128x128xf32>
    %20 = math.tanh %19 : vector<128x128xf32>
    %c0_15 = arith.constant 0 : index
    %c0_16 = arith.constant 0 : index
    %21 = vector.load %arg8[%c0_15, %c0_16] : memref<128x1xf32, #tpu.memory_space<vmem>>, vector<128x1xf32>
    %22 = vector.broadcast %21 : vector<128x1xf32> to vector<128x128xf32>
    %23 = arith.mulf %20, %22 : vector<128x128xf32>
    %cst_17 = arith.constant dense<0.000000e+00> : vector<128xf32>
    %24 = vector.multi_reduction <add>, %23, %cst_17 [0] : vector<128x128xf32> to vector<128xf32>
    %25 = vector.shape_cast %24 : vector<128xf32> to vector<1x128xf32>
    %c0_18 = arith.constant 0 : index
    %c0_19 = arith.constant 0 : index
    %26 = vector.load %arg9[%c0_18, %c0_19] : memref<1x1xf32, #tpu.memory_space<vmem>>, vector<1x1xf32>
    %27 = vector.broadcast %26 : vector<1x1xf32> to vector<1x128xf32>
    %28 = arith.addf %25, %27 : vector<1x128xf32>
    %c0_20 = arith.constant 0 : index
    %c0_21 = arith.constant 0 : index
    %29 = vector.load %arg10[%c0_20, %c0_21] : memref<1x128xf32, #tpu.memory_space<vmem>>, vector<1x128xf32>
    tpu.vector_store %arg10[%c0_20, %c0_21], %28 {strides = array<i32>} : memref<1x128xf32, #tpu.memory_space<vmem>>, vector<1x128xf32>,
    return
  }
  func.func @transform_0(%arg0: i32) -> (i32, i32) {
    %c0_i32 = arith.constant 0 : i32
    %c0_i32_0 = arith.constant 0 : i32
    return %c0_i32, %arg0 : i32, i32
  }
  func.func @transform_1(%arg0: i32) -> (i32, i32) {
    %c0_i32 = arith.constant 0 : i32
    %c0_i32_0 = arith.constant 0 : i32
    %c0_i32_1 = arith.constant 0 : i32
    return %c0_i32, %c0_i32_0 : i32, i32
  }
  func.func @transform_2(%arg0: i32) -> (i32, i32) {
    %c0_i32 = arith.constant 0 : i32
    %c0_i32_0 = arith.constant 0 : i32
    %c0_i32_1 = arith.constant 0 : i32
    return %c0_i32, %c0_i32_0 : i32, i32
  }
  func.func @transform_3(%arg0: i32) -> (i32, i32) {
    %c0_i32 = arith.constant 0 : i32
    %c0_i32_0 = arith.constant 0 : i32
    %c0_i32_1 = arith.constant 0 : i32
    return %c0_i32, %c0_i32_0 : i32, i32
  }
  func.func @transform_4(%arg0: i32) -> (i32, i32) {
    %c0_i32 = arith.constant 0 : i32
    %c0_i32_0 = arith.constant 0 : i32
    %c0_i32_1 = arith.constant 0 : i32
    return %c0_i32, %c0_i32_0 : i32, i32
  }
  func.func @transform_5(%arg0: i32) -> (i32, i32) {
    %c0_i32 = arith.constant 0 : i32
    %c0_i32_0 = arith.constant 0 : i32
    %c0_i32_1 = arith.constant 0 : i32
    return %c0_i32, %c0_i32_0 : i32, i32
  }
  func.func @transform_6(%arg0: i32) -> (i32, i32) {
    %c0_i32 = arith.constant 0 : i32
    %c0_i32_0 = arith.constant 0 : i32
    %c0_i32_1 = arith.constant 0 : i32
    return %c0_i32, %c0_i32_0 : i32, i32
  }
  func.func @transform_7(%arg0: i32) -> (i32, i32) {
    %c0_i32 = arith.constant 0 : i32
    %c0_i32_0 = arith.constant 0 : i32
    %c0_i32_1 = arith.constant 0 : i32
    return %c0_i32, %c0_i32_0 : i32, i32
  }
  func.func @transform_8(%arg0: i32) -> (i32, i32) {
    %c0_i32 = arith.constant 0 : i32
    %c0_i32_0 = arith.constant 0 : i32
    %c0_i32_1 = arith.constant 0 : i32
    return %c0_i32, %c0_i32_0 : i32, i32
  }
  func.func @transform_9(%arg0: i32) -> (i32, i32) {
    %c0_i32 = arith.constant 0 : i32
    %c0_i32_0 = arith.constant 0 : i32
    return %c0_i32, %arg0 : i32, i32
  }
}

</mosaic_0001>

<bundles_post_ra>
// kernel: tpu_custom_call.1
= control target key start
LH: loop header
LB: loop body
LE: loop exit
PB: predicated region body
PF: predicated region fallthrough
CT: control target
= control target key end

     0   :  { %s1199_s0 = inlined_call_operand.vmem [shape: bf16[8,128], index: 0, kind: input, shape index: {}]   ;;  %s1200_s1 = inlined_call_operand.vmem [shape: bf16[32,8], index: 1, kind: input, shape index: {}]   ;;  %s1201_s2 = inlined_call_operand.vmem [shape: f32[32,1], index: 2, kind: input, shape index: {}]   ;;  %s1202_s3 = inlined_call_operand.vmem [shape: bf16[64,32], index: 3, kind: input, shape index: {}]   ;;  %s1203_s4 = inlined_call_operand.vmem [shape: f32[64,1], index: 4, kind: input, shape index: {}]   ;;  %s1204_s5 = inlined_call_operand.vmem [shape: bf16[128,64], index: 5, kind: input, shape index: {}]   ;;  %s1205_s6 = inlined_call_operand.vmem [shape: f32[128,1], index: 6, kind: input, shape index: {}]   ;;  %s1206_s7 = inlined_call_operand.vmem [shape: f32[128,1], index: 7, kind: input, shape index: {}]   ;;  %s1207_s8 = inlined_call_operand.<no memory space> [shape: f32[1,1], index: 8, kind: input, shape index: {}]   ;;  %s1208_s9 = inlined_call_operand.hbm [shape: f32[1,128], index: 9, kind: output, shape index: {}]  }
   0x1   :  { %v14_v0 = vstv %s1207_s8 }
   0x2   :  { %15 = vst [vmem:[#allocation2] sm:$0x1] %v14_v0 }
   0x3   :  { %v36_v1 = vld [vmem:[%s1199_s0] sm:$0xf]  ;;  %vm82_vm0 = vcmask 1043456   ;;  %v43_v2 = vld [vmem:[%s1201_s2 + $0x10] sm:$0xff]  ;;  %v952_v4 = vmov 0   ;;  %vm75_vm1 = vcmask 64512  }
   0x4   :  { %v41_v3 = vld [vmem:[%s1201_s2] sm:$0xff]  ;;  %859 = vset.pattern.permute.xlu1 %v952_v4  ;;  %858 = vset.pattern.permute.xlu0 %v952_v4  ;;  %v84_v5 = vsel %vm82_vm0, %v36_v1, 0  ;;  %v861_v7 = vld [vmem:[%s1200_s1 + $0x8] sm:$0xff]   ;;  %v44_v8 = vld [vmem:[%s1201_s2 + $0x18] sm:$0xff] }
   0x5   :  { %v860_v6 = vld [vmem:[%s1200_s1] sm:$0xff]   ;;  %855 = vmatprep.subr.msk.bf16.mxu1 %vm82_vm0, %v36_v1  ;;  %57 = vperm.xlu0 %858, %v43_v2   ;;  %v42_v9 = vld [vmem:[%s1201_s2 + $0x8] sm:$0xff]  ;;  %v155_v10 = vld [vmem:[%s1203_s4 + $0x30] sm:$0xff] }
   0x6   :  { %47 = vperm.xlu1 %859, %v41_v3   ;;  %806 = vmatpush3.bf16.msra.mxu1 %v84_v5  ;;  %v156_v11 = vld [vmem:[%s1203_s4 + $0x38] sm:$0xff]  ;;  %v153_v12 = vld [vmem:[%s1203_s4 + $0x20] sm:$0xff]  ;;  %v154_v13 = vld [vmem:[%s1203_s4 + $0x28] sm:$0xff] }
   0x7   :  { %807 = vmatprep.mubr.msk.bf16.mxu1 %vm75_vm1, %v860_v6  ;;  %v151_v14 = vld [vmem:[%s1203_s4 + $0x10] sm:$0xff]  ;;  %v152_v15 = vld [vmem:[%s1203_s4 + $0x18] sm:$0xff]  ;;  %v149_v16 = vld [vmem:[%s1203_s4] sm:$0xff] }
   0x8   :  { %v150_v17 = vld [vmem:[%s1203_s4 + $0x8] sm:$0xff]  ;;  %v323_v18 = vld [vmem:[%s1205_s6] sm:$0xff] }
   0x9   :  { %808 = vmatmul.mubr.msk.bf16.vlgmr.msra.gmra.mxu1 %vm75_vm1, %v861_v7  ;;  %62 = vperm.xlu0 %858, %v44_v8   ;;  %v324_v19 = vld [vmem:[%s1205_s6 + $0x8] sm:$0xff] }
   0xa   :  { %52 = vperm.xlu1 %859, %v42_v9  }
   0xd   :  { %189 = vperm.xlu0 %858, %v155_v10  }
   0xe   :  { %194 = vperm.xlu1 %859, %v156_v11  }
  0x11   :  { %179 = vperm.xlu0 %858, %v153_v12  }
  0x12   :  { %184 = vperm.xlu1 %859, %v154_v13  }
  0x15   :  { %169 = vperm.xlu0 %858, %v151_v14  }
  0x16   :  { %174 = vperm.xlu1 %859, %v152_v15  }
  0x19   :  { %159 = vperm.xlu0 %858, %v149_v16  }
  0x1a   :  { %164 = vperm.xlu1 %859, %v150_v17  }
  0x1b   :  { %16 = vsyncpa [#allocation4], 0  ;;  %v325_v20 = vld [vmem:[%s1205_s6 + $0x10] sm:$0xff]  ;;  %v326_v21 = vld [vmem:[%s1205_s6 + $0x18] sm:$0xff]  ;;  %vm217_vm2 = vcmask 261120   ;;  %vm459_vm3 = vcmask 523264  }
  0x1c   :  { %v327_v22 = vld [vmem:[%s1205_s6 + $0x20] sm:$0xff]  ;;  %v328_v23 = vld [vmem:[%s1205_s6 + $0x28] sm:$0xff]  ;;  %v329_v24 = vld [vmem:[%s1205_s6 + $0x30] sm:$0xff] }
  0x1d   :  { %341 = vperm.xlu0 %858, %v323_v18   ;;  %v330_v25 = vld [vmem:[%s1205_s6 + $0x38] sm:$0xff]  ;;  %v331_v26 = vld [vmem:[%s1205_s6 + $0x40] sm:$0xff]  ;;  %v332_v27 = vld [vmem:[%s1205_s6 + $0x48] sm:$0xff] }
  0x1e   :  { %346 = vperm.xlu1 %859, %v324_v19   ;;  %v597_v28 = vld [vmem:[%s1206_s7] sm:$0xff]  ;;  %v598_v29 = vld [vmem:[%s1206_s7 + $0x8] sm:$0xff]  ;;  %v333_v30 = vld [vmem:[%s1205_s6 + $0x50] sm:$0xff] }
  0x1f   :  { %v599_v31 = vld [vmem:[%s1206_s7 + $0x10] sm:$0xff]  ;;  %v334_v32 = vld [vmem:[%s1205_s6 + $0x58] sm:$0xff]  ;;  %v335_v34 = vld [vmem:[%s1205_s6 + $0x60] sm:$0xff] }
  0x20   :  { %v600_v33 = vld [vmem:[%s1206_s7 + $0x18] sm:$0xff]  ;;  %v601_v35 = vld [vmem:[%s1206_s7 + $0x20] sm:$0xff]  ;;  %v336_v36 = vld [vmem:[%s1205_s6 + $0x68] sm:$0xff] }
  0x21   :  { %351 = vperm.xlu0 %858, %v325_v20   ;;  %v602_v37 = vld [vmem:[%s1206_s7 + $0x28] sm:$0xff]  ;;  %v337_v38 = vld [vmem:[%s1205_s6 + $0x70] sm:$0xff]  ;;  %v338_v40 = vld [vmem:[%s1205_s6 + $0x78] sm:$0xff] }
  0x22   :  { %356 = vperm.xlu1 %859, %v326_v21   ;;  %v603_v39 = vld [vmem:[%s1206_s7 + $0x30] sm:$0xff]  ;;  %v604_v41 = vld [vmem:[%s1206_s7 + $0x38] sm:$0xff]  ;;  %v605_v42 = vld [vmem:[%s1206_s7 + $0x40] sm:$0xff] }
  0x23   :  { %v606_v43 = vld [vmem:[%s1206_s7 + $0x48] sm:$0xff]  ;;  %v607_v44 = vld [vmem:[%s1206_s7 + $0x50] sm:$0xff]  ;;  %v608_v45 = vld [vmem:[%s1206_s7 + $0x58] sm:$0xff] }
  0x24   :  { %v609_v46 = vld [vmem:[%s1206_s7 + $0x60] sm:$0xff]  ;;  %v610_v47 = vld [vmem:[%s1206_s7 + $0x68] sm:$0xff]  ;;  %v611_v48 = vld [vmem:[%s1206_s7 + $0x70] sm:$0xff] }
  0x25   :  { %361 = vperm.xlu0 %858, %v327_v22   ;;  %v612_v49 = vld [vmem:[%s1206_s7 + $0x78] sm:$0xff]  ;;  %v730_v50 = vld [vmem:[#allocation2] sm:$0x1]  ;;  %v863_v6 = vld [vmem:[%s1202_s3 + $0x8] sm:$0xff]  }
  0x26   :  { %366 = vperm.xlu1 %859, %v328_v23   ;;  %v862_v51 = vld [vmem:[%s1202_s3] sm:$0xff]   ;;  %v864_v7 = vld [vmem:[%s1202_s3 + $0x10] sm:$0xff]   ;;  %v865_v8 = vld [vmem:[%s1202_s3 + $0x18] sm:$0xff]  }
  0x27   :  { %815 = vmatprep.mubr.msk.bf16.mxu1 %vm217_vm2, %v862_v51  ;;  %v866_v9 = vld [vmem:[%s1204_s5] sm:$0xff]   ;;  %v867_v10 = vld [vmem:[%s1204_s5 + $0x30] sm:$0xff]  }
  0x28   :  { %831 = vmatprep.mubr.msk.bf16.mxu0 %vm459_vm3, %v866_v9  ;;  %v872_v51 = vld [vmem:[%s1204_s5 + $0x20] sm:$0xff]  }
  0x29   :  { %371 = vperm.xlu0 %858, %v329_v24  }
  0x2a   :  { %376 = vperm.xlu1 %859, %v330_v25  }
  0x2d   :  { %381 = vperm.xlu0 %858, %v331_v26  }
  0x2e   :  { %386 = vperm.xlu1 %859, %v332_v27  }
  0x31   :  { %615 = vperm.xlu0 %858, %v597_v28  }
  0x32   :  { %620 = vperm.xlu1 %859, %v598_v29  }
  0x35   :  { %391 = vperm.xlu0 %858, %v333_v30  }
  0x36   :  { %625 = vperm.xlu1 %859, %v599_v31  }
  0x39   :  { %396 = vperm.xlu0 %858, %v334_v32  }
  0x3a   :  { %630 = vperm.xlu1 %859, %v600_v33  }
  0x3d   :  { %401 = vperm.xlu0 %858, %v335_v34  }
  0x3e   :  { %635 = vperm.xlu1 %859, %v601_v35  }
  0x41   :  { %406 = vperm.xlu0 %858, %v336_v36  }
  0x42   :  { %640 = vperm.xlu1 %859, %v602_v37  }
  0x45   :  { %411 = vperm.xlu0 %858, %v337_v38  }
  0x46   :  { %645 = vperm.xlu1 %859, %v603_v39  }
  0x49   :  { %416 = vperm.xlu0 %858, %v338_v40  }
  0x4a   :  { %650 = vperm.xlu1 %859, %v604_v41  }
  0x4d   :  { %655 = vperm.xlu0 %858, %v605_v42  }
  0x4e   :  { %660 = vperm.xlu1 %859, %v606_v43  }
  0x51   :  { %665 = vperm.xlu0 %858, %v607_v44  }
  0x52   :  { %670 = vperm.xlu1 %859, %v608_v45  }
  0x55   :  { %675 = vperm.xlu0 %858, %v609_v46  }
  0x56   :  { %680 = vperm.xlu1 %859, %v610_v47   ;;  %v868_v47 = vld [vmem:[%s1204_s5 + $0x8] sm:$0xff]  }
  0x59   :  { %685 = vperm.xlu0 %858, %v611_v48   ;;  %v869_v48 = vld [vmem:[%s1204_s5 + $0x38] sm:$0xff]  }
  0x5a   :  { %690 = vperm.xlu1 %859, %v612_v49   ;;  %v870_v49 = vld [vmem:[%s1204_s5 + $0x10] sm:$0xff]  }
  0x5d   :  { %733 = vperm.xlu0 %858, %v730_v50   ;;  %v871_v50 = vld [vmem:[%s1204_s5 + $0x18] sm:$0xff]  }
  0x80   :  { %v58_v52 = vpop.permute.xlu0 %57 }
  0x81   :  { %v48_v53 = vpop.permute.xlu1 %47 }
  0x84   :  { %v63_v57 = vpop.permute.xlu0 %62 }
  0x85   :  { %v53_v61 = vpop.permute.xlu1 %52 }
  0x88   :  { %v190_v13 = vpop.permute.xlu0 %189 }
  0x89   :  { %v195_v11 = vpop.permute.xlu1 %194 }
  0x8c   :  { %v180_v18 = vpop.permute.xlu0 %179 }
  0x8d   :  { %v185_v16 = vpop.permute.xlu1 %184 }
  0x90   :  { %v170_v26 = vpop.permute.xlu0 %169 }
  0x91   :  { %v175_v22 = vpop.permute.xlu1 %174 }
  0x94   :  { %v160_v33 = vpop.permute.xlu0 %159 }
  0x95   :  { %v165_v31 = vpop.permute.xlu1 %164 }
  0xc9   :  { %v809_v54 = vpop.f32.mrf.mxu1 }
  0xca   :  { %v129_v55 = vadd.f32 %v809_v54, %v58_v52  ;;  %v873_v52 = vld [vmem:[%s1204_s5 + $0x28] sm:$0xff]   ;;  %v347_v54 = vpop.permute.xlu1 %346  ;;  %s953_s5 = smov [#allocation3]  }
  0xcb   :  { %v120_v56 = vpop.f32.mrf.mxu1  ;;  %s748_s20 = sshll.u32 %s953_s5, 4  ;;  %s749_s20 = int_to_ptr.vmem [resolvable:$true] %s748_s20 }
  0xcc   :  { %v121_v58 = vadd.f32 %v120_v56, %v48_v53  ;;  %874 = vtanh.f32 %v129_v55  ;;  %v342_v53 = vpop.permute.xlu0 %341  ;;  %s930_s4 = scalar_lea.vmem %s749_s20, 16  ;;  %s934_s21 = scalar_lea.vmem %s749_s20, 32 }
  0xcd   :  { %v810_v59 = vpop.f32.mrf.mxu1  ;;  %p931_p0 = scmp.ne.s32.totalorder %s749_s20, %s930_s4  ;;  %p935_p1 = scmp.lt.s32.totalorder %s749_s20, %s749_s20 }
  0xce   :  { %v132_v60 = vadd.f32 %v810_v59, %v63_v57  ;;  %v357_v56 = vpop.permute.xlu1 %356  ;;  %p936_p2 = scmp.lt.s32.totalorder %s934_s21, %s930_s4 }
  0xcf   :  { %v123_v62 = vpop.f32.mrf.mxu1 }
  0xd0   :  { %876 = vtanh.f32 %v132_v60  ;;  %v124_v63 = vadd.f32 %v123_v62, %v53_v61  ;;  %v352_v55 = vpop.permute.xlu0 %351  ;;  %p937_p3 = por %p936_p2, %p935_p1 }
  0xd1   :  { %878 = vtanh.f32 %v121_v58 }
  0xd2   :  { %880 = vtanh.f32 %v124_v63  ;;  %v367_v58 = vpop.permute.xlu1 %366  ;;  %p938_p4 = pnand %p937_p3, %p931_p0 }
  0xd4   :  { %v362_v57 = vpop.permute.xlu0 %361 }
  0xd6   :  { %v377_v60 = vpop.permute.xlu1 %376 }
  0xd8   :  { %v372_v59 = vpop.permute.xlu0 %371 }
  0xd9   :  { %v875_v0 = vpop.eup %874 }
  0xda   :  { %v387_v62 = vpop.permute.xlu1 %386 }
  0xdc   :  { %v382_v61 = vpop.permute.xlu0 %381 }
  0xdd   :  { %v877_v1 = vpop.eup %876 }
  0xde   :  { %v879_v2 = vpop.eup %878  ;;  %v148_v3 = vpack.c.bf16 %v877_v1, %v875_v0  ;;  %v621_v0 = vpop.permute.xlu1 %620 }
  0xdf   :  { %v881_v4 = vpop.eup %880 }
  0xe0   :  { %811 = vmatprep.subr.bf16.mxu1 %v148_v3  ;;  %v147_v5 = vpack.c.bf16 %v881_v4, %v879_v2  ;;  %v616_v63 = vpop.permute.xlu0 %615 }
  0xe1   :  { %812 = vmatpush3.bf16.msra.mxu1 %v148_v3 }
  0xe2   :  { %813 = vmatprep.subr.bf16.mxu1 %v147_v5  ;;  %v626_v2 = vpop.permute.xlu1 %625 }
  0xe4   :  { %v392_v1 = vpop.permute.xlu0 %391 }
  0xe5   :  { %814 = vmatpush3.bf16.msra.mxu1 %v147_v5 }
  0xe6   :  { %v631_v5 = vpop.permute.xlu1 %630 }
  0xe8   :  { %816 = vmatmul.mubr.msk.bf16.vlgmr.msra.gmra.mxu1 %vm217_vm2, %v863_v6  ;;  %v397_v3 = vpop.permute.xlu0 %396 }
  0xe9   :  { %819 = vmatprep.mubr.msk.bf16.mxu1 %vm217_vm2, %v864_v7 }
  0xf0   :  { %820 = vmatmul.mubr.msk.bf16.gmra.mxu1 %vm217_vm2, %v865_v8 }
  0xf1   :  { %843 = vmatprep.mubr.msk.bf16.mxu1 %vm459_vm3, %v867_v10  ;;  %v402_v10 = vpop.permute.xlu0 %401 }
 0x1a8   :  { %v817_v12 = vpop.f32.mrf.mxu1 }
 0x1a9   :  { %v273_v30 = vadd.f32 %v817_v12, %v170_v26  ;;  %v636_v12 = vpop.permute.xlu1 %635 }
 0x1aa   :  { %v264_v14 = vpop.f32.mrf.mxu1 }
 0x1ab   :  { %v265_v34 = vadd.f32 %v264_v14, %v160_v33 }
 0x1ac   :  { %v818_v15 = vpop.f32.mrf.mxu1 }
 0x1ad   :  { %v276_v28 = vadd.f32 %v818_v15, %v175_v22  ;;  %v641_v22 = vpop.permute.xlu1 %640 }
 0x1ae   :  { %v267_v17 = vpop.f32.mrf.mxu1 }
 0x1af   :  { %v268_v32 = vadd.f32 %v267_v17, %v165_v31  ;;  %v407_v17 = vpop.permute.xlu0 %406 }
 0x1b0   :  { %v821_v19 = vpop.f32.mrf.mxu1 }
 0x1b1   :  { %v289_v20 = vadd.f32 %v821_v19, %v190_v13 }
 0x1b2   :  { %v280_v21 = vpop.f32.mrf.mxu1 }
 0x1b3   :  { %v281_v23 = vadd.f32 %v280_v21, %v180_v18  ;;  %882 = vtanh.f32 %v289_v20 }
 0x1b4   :  { %v822_v24 = vpop.f32.mrf.mxu1 }
 0x1b5   :  { %v292_v25 = vadd.f32 %v822_v24, %v195_v11 }
 0x1b6   :  { %v283_v27 = vpop.f32.mrf.mxu1 }
 0x1b7   :  { %884 = vtanh.f32 %v292_v25  ;;  %v284_v29 = vadd.f32 %v283_v27, %v185_v16 }
 0x1b8   :  { %886 = vtanh.f32 %v281_v23 }
 0x1b9   :  { %888 = vtanh.f32 %v284_v29 }
 0x1ba   :  { %890 = vtanh.f32 %v276_v28  ;;  %v412_v28 = vpop.permute.xlu0 %411 }
 0x1bb   :  { %892 = vtanh.f32 %v273_v30  ;;  %v646_v30 = vpop.permute.xlu1 %645 }
 0x1bc   :  { %894 = vtanh.f32 %v268_v32 }
 0x1bd   :  { %896 = vtanh.f32 %v265_v34 }
 0x1c0   :  { %v883_v35 = vpop.eup %882 }
 0x1c4   :  { %v885_v36 = vpop.eup %884 }
 0x1c5   :  { %v887_v37 = vpop.eup %886  ;;  %v322_v38 = vpack.c.bf16 %v885_v36, %v883_v35 }
 0x1c6   :  { %v889_v39 = vpop.eup %888 }
 0x1c7   :  { %823 = vmatprep.subr.bf16.mxu0 %v322_v38  ;;  %847 = vmatprep.subr.bf16.mxu1 %v322_v38  ;;  %v321_v40 = vpack.c.bf16 %v889_v39, %v887_v37  ;;  %v891_v41 = vpop.eup %890 }
 0x1c8   :  { %824 = vmatpush3.bf16.msra.mxu0 %v322_v38  ;;  %851 = vmatpush3.bf16.msra.mxu1 %v322_v38  ;;  %v893_v42 = vpop.eup %892 }
 0x1c9   :  { %825 = vmatprep.subr.bf16.mxu0 %v321_v40  ;;  %848 = vmatprep.subr.bf16.mxu1 %v321_v40  ;;  %v320_v43 = vpack.c.bf16 %v891_v41, %v893_v42  ;;  %v895_v44 = vpop.eup %894 }
 0x1ca   :  { %v897_v45 = vpop.eup %896 }
 0x1cb   :  { %v319_v46 = vpack.c.bf16 %v895_v44, %v897_v45  ;;  %v417_v44 = vpop.permute.xlu0 %416 }
 0x1cc   :  { %826 = vmatpush3.bf16.msra.mxu0 %v321_v40  ;;  %852 = vmatpush3.bf16.msra.mxu1 %v321_v40 }
 0x1cd   :  { %827 = vmatprep.subr.bf16.mxu0 %v320_v43  ;;  %849 = vmatprep.subr.bf16.mxu1 %v320_v43 }
 0x1d0   :  { %828 = vmatpush3.bf16.msra.mxu0 %v320_v43  ;;  %853 = vmatpush3.bf16.msra.mxu1 %v320_v43 }
 0x1d1   :  { %829 = vmatprep.subr.bf16.mxu0 %v319_v46  ;;  %850 = vmatprep.subr.bf16.mxu1 %v319_v46 }
 0x1d4   :  { %830 = vmatpush3.bf16.msra.mxu0 %v319_v46  ;;  %854 = vmatpush3.bf16.msra.mxu1 %v319_v46 }
 0x1d7   :  { %832 = vmatmul.mubr.msk.bf16.vlgmr.msra.gmra.mxu0 %vm459_vm3, %v868_v47  ;;  %844 = vmatmul.mubr.msk.bf16.vlgmr.msra.gmra.mxu1 %vm459_vm3, %v869_v48 }
 0x1d8   :  { %835 = vmatprep.mubr.msk.bf16.mxu0 %vm459_vm3, %v870_v49 }
 0x1df   :  { %836 = vmatmul.mubr.msk.bf16.gmra.mxu0 %vm459_vm3, %v871_v50  ;;  %v651_v50 = vpop.permute.xlu1 %650 }
 0x1e0   :  { %839 = vmatprep.mubr.msk.bf16.mxu0 %vm459_vm3, %v872_v51 }
 0x1e7   :  { %840 = vmatmul.mubr.msk.bf16.gmra.mxu0 %vm459_vm3, %v873_v52 }
 0x297   :  { %v833_v4 = vpop.f32.mrf.mxu0  ;;  %v845_v19 = vpop.f32.mrf.mxu1 }
 0x298   :  { %v527_v8 = vadd.f32 %v833_v4, %v352_v55  ;;  %v575_v55 = vadd.f32 %v845_v19, %v412_v28 }
 0x299   :  { %v518_v6 = vpop.f32.mrf.mxu0  ;;  %v566_v26 = vpop.f32.mrf.mxu1 }
 0x29a   :  { %v519_v7 = vadd.f32 %v518_v6, %v342_v53  ;;  %v567_v47 = vadd.f32 %v566_v26, %v402_v10 }
 0x29b   :  { %v834_v9 = vpop.f32.mrf.mxu0  ;;  %v846_v33 = vpop.f32.mrf.mxu1 }
 0x29c   :  { %898 = vtanh.f32 %v519_v7  ;;  %v530_v13 = vadd.f32 %v834_v9, %v357_v56 }
 0x29d   :  { %v521_v11 = vpop.f32.mrf.mxu0  ;;  %900 = vtanh.f32 %v527_v8  ;;  %v569_v45 = vpop.f32.mrf.mxu1 }
 0x29e   :  { %v522_v14 = vadd.f32 %v521_v11, %v347_v54  ;;  %v570_v53 = vadd.f32 %v569_v45, %v407_v17 }
 0x29f   :  { %v837_v15 = vpop.f32.mrf.mxu0 }
 0x2a0   :  { %902 = vtanh.f32 %v522_v14  ;;  %v543_v20 = vadd.f32 %v837_v15, %v372_v59  ;;  %v656_v59 = vpop.permute.xlu0 %655 }
 0x2a1   :  { %v534_v16 = vpop.f32.mrf.mxu0  ;;  %904 = vtanh.f32 %v530_v13 }
 0x2a2   :  { %v535_v18 = vadd.f32 %v534_v16, %v362_v57 }
 0x2a3   :  { %v838_v21 = vpop.f32.mrf.mxu0 }
 0x2a4   :  { %906 = vtanh.f32 %v535_v18  ;;  %v546_v24 = vadd.f32 %v838_v21, %v377_v60  ;;  %v578_v60 = vadd.f32 %v846_v33, %v417_v44  ;;  %v666_v6 = vpop.permute.xlu0 %665 }
 0x2a5   :  { %v537_v23 = vpop.f32.mrf.mxu0  ;;  %908 = vtanh.f32 %v543_v20 }
 0x2a6   :  { %v538_v25 = vadd.f32 %v537_v23, %v367_v58 }
 0x2a7   :  { %v841_v27 = vpop.f32.mrf.mxu0 }
 0x2a8   :  { %910 = vtanh.f32 %v538_v25  ;;  %v559_v34 = vadd.f32 %v841_v27, %v392_v1  ;;  %v676_v18 = vpop.permute.xlu0 %675 }
 0x2a9   :  { %v550_v29 = vpop.f32.mrf.mxu0  ;;  %912 = vtanh.f32 %v546_v24  ;;  %v899_v32 = vpop.eup %898 }
 0x2aa   :  { %v551_v31 = vadd.f32 %v550_v29, %v382_v61  ;;  %v901_v36 = vpop.eup %900  ;;  %v693_v39 = vmul.f32 %v899_v32, %v616_v63 }
 0x2ab   :  { %v842_v35 = vpop.f32.mrf.mxu0  ;;  %v695_v46 = vmul.f32 %v901_v36, %v626_v2 }
 0x2ac   :  { %914 = vtanh.f32 %v551_v31  ;;  %v562_v41 = vadd.f32 %v842_v35, %v397_v3  ;;  %v686_v29 = vpop.permute.xlu0 %685  ;;  %v736_v35 = vlaneseq }
 0x2ad   :  { %v903_v37 = vpop.eup %902  ;;  %v553_v38 = vpop.f32.mrf.mxu0  ;;  %916 = vtanh.f32 %v559_v34 }
 0x2ae   :  { %v694_v40 = vmul.f32 %v903_v37, %v621_v0  ;;  %v554_v42 = vadd.f32 %v553_v38, %v387_v62  ;;  %v905_v43 = vpop.eup %904  ;;  %v661_v0 = vpop.permute.xlu1 %660  ;;  %v737_v38 = vshrl.u32 %v736_v35, 7 }
 0x2af   :  { %v696_v51 = vmul.f32 %v905_v43, %v631_v5 }
 0x2b0   :  { %v709_v48 = vadd.f32 %v694_v40, %v693_v39  ;;  %918 = vtanh.f32 %v554_v42  ;;  %v734_v43 = vpop.permute.xlu0 %733 }
 0x2b1   :  { %v907_v49 = vpop.eup %906  ;;  %920 = vtanh.f32 %v562_v41  ;;  %v738_v41 = vsub.s32 0, %v737_v38 }
 0x2b2   :  { %v710_v52 = vadd.f32 %v709_v48, %v695_v46  ;;  %v909_v54 = vpop.eup %908  ;;  %922 = vtanh.f32 %v567_v47  ;;  %v697_v56 = vmul.f32 %v907_v49, %v636_v12  ;;  %v671_v11 = vpop.permute.xlu1 %670 }
 0x2b3   :  { %924 = vtanh.f32 %v570_v53  ;;  %v699_v1 = vmul.f32 %v909_v54, %v646_v30  ;;  %v739_v45 = vrot.slane %v734_v43, %v738_v41 }
 0x2b4   :  { %v711_v57 = vadd.f32 %v710_v52, %v696_v51  ;;  %926 = vtanh.f32 %v575_v55 }
 0x2b5   :  { %v911_v58 = vpop.eup %910  ;;  %928 = vtanh.f32 %v578_v60 }
 0x2b6   :  { %v712_v61 = vadd.f32 %v711_v57, %v697_v56  ;;  %v698_v62 = vmul.f32 %v911_v58, %v641_v22  ;;  %v913_v63 = vpop.eup %912  ;;  %v681_v22 = vpop.permute.xlu1 %680 }
 0x2b7   :  { %v700_v4 = vmul.f32 %v913_v63, %v651_v50 }
 0x2b8   :  { %v713_v2 = vadd.f32 %v712_v61, %v698_v62 }
 0x2b9   :  { %v915_v3 = vpop.eup %914 }
 0x2ba   :  { %v714_v5 = vadd.f32 %v713_v2, %v699_v1  ;;  %v917_v7 = vpop.eup %916  ;;  %v701_v8 = vmul.f32 %v915_v3, %v656_v59  ;;  %v691_v32 = vpop.permute.xlu1 %690 }
 0x2bb   :  { %v703_v15 = vmul.f32 %v917_v7, %v666_v6 }
 0x2bc   :  { %v715_v9 = vadd.f32 %v714_v5, %v700_v4 }
 0x2bd   :  { %v919_v10 = vpop.eup %918 }
 0x2be   :  { %v716_v12 = vadd.f32 %v715_v9, %v701_v8  ;;  %v702_v13 = vmul.f32 %v919_v10, %v661_v0  ;;  %v921_v14 = vpop.eup %920 }
 0x2bf   :  { %v923_v17 = vpop.eup %922  ;;  %v704_v19 = vmul.f32 %v921_v14, %v671_v11 }
 0x2c0   :  { %v717_v16 = vadd.f32 %v716_v12, %v702_v13  ;;  %v925_v21 = vpop.eup %924  ;;  %v705_v23 = vmul.f32 %v923_v17, %v676_v18 }
 0x2c1   :  { %v927_v25 = vpop.eup %926  ;;  %v706_v26 = vmul.f32 %v925_v21, %v681_v22 }
 0x2c2   :  { %v718_v20 = vadd.f32 %v717_v16, %v703_v15  ;;  %v929_v28 = vpop.eup %928  ;;  %v707_v30 = vmul.f32 %v927_v25, %v686_v29 }
 0x2c3   :  { %v708_v33 = vmul.f32 %v929_v28, %v691_v32 }
 0x2c4   :  { %v719_v24 = vadd.f32 %v718_v20, %v704_v19 }
 0x2c6   :  { %v720_v27 = vadd.f32 %v719_v24, %v705_v23 }
 0x2c8   :  { %v721_v31 = vadd.f32 %v720_v27, %v706_v26 }
 0x2ca   :  { %v722_v34 = vadd.f32 %v721_v31, %v707_v30 }
 0x2cc   :  { %v723_v36 = vadd.f32 %v722_v34, %v708_v33 }
 0x2ce   :  { %v724_v37 = vrot.slane %v723_v36, 4 }
 0x2d0   :  { %v725_v39 = vadd.f32 %v724_v37, %v723_v36 }
 0x2d2   :  { %v726_v40 = vrot.slane %v725_v39, 2 }
 0x2d4   :  { %v727_v42 = vadd.f32 %v726_v40, %v725_v39 }
 0x2d6   :  { %v728_v44 = vrot.slane %v727_v42, 1 }
 0x2d8   :  { %v729_v46 = vadd.f32 %v728_v44, %v727_v42 }
 0x2da   :  { %v740_v47 = vadd.f32 %v739_v45, %v729_v46 }
 0x2dc   :  { %741 = vst [vmem:[#allocation3] sm:$0x1] %v740_v47 }
 0x2dd   :  { %941 = shalt.err (!%p938_p4)
}
 0x2de   :  { %751 = dma.vmem_to_hbm [thread:$0]  %s749_s20, 16, %s1208_s9, [#allocation4]  }
 0x2df   :  { %950 = dma.done.wait [#allocation4], 16  }
 0x2e0   :  { %951 = vsyncadd [#allocation4], 4294967280 }
 0x2e1   :  { %755 = vsyncpa [#allocation4], 1 }

</bundles_post_ra>
